<compile_context>
chip_gen: v7x
topology: tpu7x:2x2x1
jax: 0.10.0
libtpu: 0.0.40
codegen_flags: <defaults>
</compile_context>

<pallas_src>
import jax
import jax.numpy as jnp
from jax.experimental import pallas as pl
from jax.experimental.pallas import tpu as pltpu


def _round_up(x, m):
    return ((x + m - 1) // m) * m


def mlp_kernel(x_ref, w1_ref, b1_ref, w2_ref, b2_ref, w3_ref, b3_ref, o_ref):
    # In-kernel cast of the f32 input block to bf16 (feeds MXU at native rate,
    # avoids a separate wrapper-side cast pass over x in HBM).
    x = x_ref[...].astype(jnp.bfloat16)
    # fc1 + ReLU  (bf16 operands, f32 MXU accumulation)
    h1 = jnp.dot(x, w1_ref[...], preferred_element_type=jnp.float32)
    h1 = jnp.maximum(h1 + b1_ref[...], 0.0)
    # dropout(p=0.0) is the identity -> omitted
    # fc2 + ReLU
    h2 = jnp.dot(h1.astype(jnp.bfloat16), w2_ref[...],
                 preferred_element_type=jnp.float32)
    h2 = jnp.maximum(h2 + b2_ref[...], 0.0)
    # fc3 (no activation); output columns padded to 128 lanes (lane-dense vst)
    h3 = jnp.dot(h2.astype(jnp.bfloat16), w3_ref[...],
                 preferred_element_type=jnp.float32)
    o_ref[...] = (h3 + b3_ref[...]).astype(o_ref.dtype)


def prepare_params(params, *, n_pad=128):
    """One-time preprocessing (hoisted out of the forward pass).

    Casts weights to bf16 and pads fc3's output dim 10 -> 128 lanes so the
    kernel's output tile is lane-dense. Biases stay f32 (added after f32
    accumulation). Returns a tuple consumed by mlp_forward.
    """
    w1, b1, w2, b2, w3, b3 = params
    n_out = w3.shape[1]
    w3p = jnp.zeros((w3.shape[0], n_pad), w3.dtype).at[:, :n_out].set(w3)
    b3p = jnp.zeros((1, n_pad), b3.dtype).at[:, :n_out].set(b3)
    return (w1.astype(jnp.bfloat16), b1,
            w2.astype(jnp.bfloat16), b2,
            w3p.astype(jnp.bfloat16), b3p,
            n_out)


def _select_batch_tile(B, batch_tile):
    # Multiple of 16 (bf16 sublane packing for the MXU operands), never larger
    # than needed for B, and >= 2 grid steps whenever B > 16 so the "parallel"
    # batch axis shards across both TensorCores on v7x.
    tb = min(batch_tile, _round_up(B, 16))
    tb = max(16, (tb // 16) * 16)
    if B > 16 and pl.cdiv(B, tb) < 2:
        tb = max(16, _round_up(pl.cdiv(B, 2), 16))
    return tb


def mlp_forward(x_nchw, prepared, *, batch_tile=1024, out_dtype=jnp.float32):
    """Forward pass of the MLP using pre-processed (bf16 / padded) params."""
    w1b, b1, w2b, b2, w3b, b3p, n_out = prepared
    B = x_nchw.shape[0]
    x = x_nchw.reshape(B, -1)                       # flatten: (B, 784), free reshape
    d_in = x.shape[1]
    n_pad = w3b.shape[1]

    TB = _select_batch_tile(B, batch_tile)
    grid_b = pl.cdiv(B, TB)                         # ragged last block, no B padding

    resident = lambda shape: pl.BlockSpec(shape, lambda i: (0, 0))

    out = pl.pallas_call(
        mlp_kernel,
        out_shape=jax.ShapeDtypeStruct((B, n_pad), out_dtype),
        grid=(grid_b,),
        in_specs=[
            pl.BlockSpec((TB, d_in), lambda i: (i, 0)),   # f32 x, tiled over batch
            resident(w1b.shape), resident(b1.shape),      # weights/biases: VMEM-resident
            resident(w2b.shape), resident(b2.shape),
            resident(w3b.shape), resident(b3p.shape),
        ],
        out_specs=pl.BlockSpec((TB, n_pad), lambda i: (i, 0)),
        compiler_params=pltpu.CompilerParams(
            dimension_semantics=("parallel",)),
    )(x, w1b, b1, w2b, b2, w3b, b3p)

    return out[:, :n_out]


def init_params(key):
    # Shapes mirror nn.Linear(784,256), (256,128), (128,10) with weights stored (in, out).
    k1, k2, k3, k4, k5, k6 = jax.random.split(key, 6)
    scale = 0.02
    w1 = scale * jax.random.normal(k1, (784, 256), jnp.float32)
    b1 = scale * jax.random.normal(k2, (1, 256), jnp.float32)
    w2 = scale * jax.random.normal(k3, (256, 128), jnp.float32)
    b2 = scale * jax.random.normal(k4, (1, 128), jnp.float32)
    w3 = scale * jax.random.normal(k5, (128, 10), jnp.float32)
    b3 = scale * jax.random.normal(k6, (1, 10), jnp.float32)
    return (w1, b1, w2, b2, w3, b3)


if __name__ == "__main__":
    key = jax.random.PRNGKey(0)
    kx, kp = jax.random.split(key)

    # B=24: with the default tile selection this gives TB=16, grid=(2,) -> it
    # exercises batch tiling, VMEM-resident weights across grid steps, the
    # ragged (masked-write) last block, and the 10->128 output pad/slice.
    B = 24
    x = jax.random.normal(kx, (B, 1, 28, 28), jnp.float32)  # NCHW like MNIST
    params = init_params(kp)

    prepared = prepare_params(params)                        # one-time, hoisted
    fwd = jax.jit(lambda xb: mlp_forward(xb, prepared))
    out = jax.block_until_ready(fwd(x))

    # Reference with the same bf16 casts as the kernel (so only accumulation
    # order differs) -> tight tolerance while still catching layout bugs.
    w1, b1, w2, b2, w3, b3 = params
    f32 = lambda a: a.astype(jnp.bfloat16).astype(jnp.float32)
    xf = f32(x.reshape(B, -1))
    ref = jnp.maximum(xf @ f32(w1) + b1, 0.0)
    ref = jnp.maximum(f32(ref) @ f32(w2) + b2, 0.0)
    ref = f32(ref) @ f32(w3) + b3

    assert out.shape == (B, 10)
    assert jnp.allclose(out, ref, atol=2e-3, rtol=2e-3)

    print("KERNEL_OK")
</pallas_src>

<mosaic_0001>
module attributes {stable_mosaic.version = 11 : i64} {
  func.func @mlp_kernel(%arg0: i32, %arg1: memref<16x784xf32, #tpu.memory_space<vmem>>, %arg2: memref<784x256xbf16, #tpu.memory_space<vmem>>, %arg3: memref<1x256xf32, #tpu.memory_space<vmem>>, %arg4: memref<256x128xbf16, #tpu.memory_space<vmem>>, %arg5: memref<1x128xf32, #tpu.memory_space<vmem>>, %arg6: memref<128x128xbf16, #tpu.memory_space<vmem>>, %arg7: memref<1x128xf32, #tpu.memory_space<vmem>>, %arg8: memref<16x128xf32, #tpu.memory_space<vmem>>) attributes {dimension_semantics = [#tpu.dimension_semantics<parallel>], iteration_bounds = array<i64: 2>, scalar_prefetch = 0 : i64, scratch_operands = 0 : i64, tpu.core_type = #tpu.core_type<tc>, window_params = [{transform_indices = @transform_0, window_bounds = array<i64: 16, 784>}, {pipeline_mode = #tpu.pipeline_mode<synchronous>, transform_indices = @transform_1, window_bounds = array<i64: 784, 256>}, {pipeline_mode = #tpu.pipeline_mode<synchronous>, transform_indices = @transform_2, window_bounds = array<i64: 1, 256>}, {pipeline_mode = #tpu.pipeline_mode<synchronous>, transform_indices = @transform_3, window_bounds = array<i64: 256, 128>}, {pipeline_mode = #tpu.pipeline_mode<synchronous>, transform_indices = @transform_4, window_bounds = array<i64: 1, 128>}, {pipeline_mode = #tpu.pipeline_mode<synchronous>, transform_indices = @transform_5, window_bounds = array<i64: 128, 128>}, {pipeline_mode = #tpu.pipeline_mode<synchronous>, transform_indices = @transform_6, window_bounds = array<i64: 1, 128>}, {transform_indices = @transform_7, window_bounds = array<i64: 16, 128>}]} {
    %c0 = arith.constant 0 : index
    %c0_0 = arith.constant 0 : index
    %0 = vector.load %arg1[%c0, %c0_0] : memref<16x784xf32, #tpu.memory_space<vmem>>, vector<16x784xf32>
    %1 = arith.truncf %0 : vector<16x784xf32> to vector<16x784xbf16>
    %c0_1 = arith.constant 0 : index
    %c0_2 = arith.constant 0 : index
    %2 = vector.load %arg2[%c0_1, %c0_2] : memref<784x256xbf16, #tpu.memory_space<vmem>>, vector<784x256xbf16>
    %cst = arith.constant dense<0.000000e+00> : vector<16x256xf32>
    %3 = tpu.matmul %1, %2, %cst {dimension_numbers = #tpu.dot_dimension_numbers<[1], [0], [0], [1], [0, 0, 1, 1], [], []>} : vector<16x784xbf16>, vector<784x256xbf16>, vector<16x256xf32> -> vector<16x256xf32>
    %c0_3 = arith.constant 0 : index
    %c0_4 = arith.constant 0 : index
    %4 = vector.load %arg3[%c0_3, %c0_4] : memref<1x256xf32, #tpu.memory_space<vmem>>, vector<1x256xf32>
    %5 = vector.broadcast %4 : vector<1x256xf32> to vector<16x256xf32>
    %6 = arith.addf %3, %5 : vector<16x256xf32>
    %cst_5 = arith.constant 0.000000e+00 : f32
    %7 = vector.broadcast %cst_5 : f32 to vector<16x256xf32>
    %8 = arith.maximumf %6, %7 : vector<16x256xf32>
    %9 = arith.truncf %8 : vector<16x256xf32> to vector<16x256xbf16>
    %c0_6 = arith.constant 0 : index
    %c0_7 = arith.constant 0 : index
    %10 = vector.load %arg4[%c0_6, %c0_7] : memref<256x128xbf16, #tpu.memory_space<vmem>>, vector<256x128xbf16>
    %cst_8 = arith.constant dense<0.000000e+00> : vector<16x128xf32>
    %11 = tpu.matmul %9, %10, %cst_8 {dimension_numbers = #tpu.dot_dimension_numbers<[1], [0], [0], [1], [0, 0, 1, 1], [], []>} : vector<16x256xbf16>, vector<256x128xbf16>, vector<16x128xf32> -> vector<16x128xf32>
    %c0_9 = arith.constant 0 : index
    %c0_10 = arith.constant 0 : index
    %12 = vector.load %arg5[%c0_9, %c0_10] : memref<1x128xf32, #tpu.memory_space<vmem>>, vector<1x128xf32>
    %13 = vector.broadcast %12 : vector<1x128xf32> to vector<16x128xf32>
    %14 = arith.addf %11, %13 : vector<16x128xf32>
    %cst_11 = arith.constant 0.000000e+00 : f32
    %15 = vector.broadcast %cst_11 : f32 to vector<16x128xf32>
    %16 = arith.maximumf %14, %15 : vector<16x128xf32>
    %17 = arith.truncf %16 : vector<16x128xf32> to vector<16x128xbf16>
    %c0_12 = arith.constant 0 : index
    %c0_13 = arith.constant 0 : index
    %18 = vector.load %arg6[%c0_12, %c0_13] : memref<128x128xbf16, #tpu.memory_space<vmem>>, vector<128x128xbf16>
    %cst_14 = arith.constant dense<0.000000e+00> : vector<16x128xf32>
    %19 = tpu.matmul %17, %18, %cst_14 {dimension_numbers = #tpu.dot_dimension_numbers<[1], [0], [0], [1], [0, 0, 1, 1], [], []>} : vector<16x128xbf16>, vector<128x128xbf16>, vector<16x128xf32> -> vector<16x128xf32>
    %c0_15 = arith.constant 0 : index
    %c0_16 = arith.constant 0 : index
    %20 = vector.load %arg7[%c0_15, %c0_16] : memref<1x128xf32, #tpu.memory_space<vmem>>, vector<1x128xf32>
    %21 = vector.broadcast %20 : vector<1x128xf32> to vector<16x128xf32>
    %22 = arith.addf %19, %21 : vector<16x128xf32>
    %c0_17 = arith.constant 0 : index
    %c0_18 = arith.constant 0 : index
    %23 = vector.load %arg8[%c0_17, %c0_18] : memref<16x128xf32, #tpu.memory_space<vmem>>, vector<16x128xf32>
    tpu.vector_store %arg8[%c0_17, %c0_18], %22 {strides = array<i32>} : memref<16x128xf32, #tpu.memory_space<vmem>>, vector<16x128xf32>,
    return
  }
  func.func @transform_0(%arg0: i32) -> (i32, i32) {
    %c0_i32 = arith.constant 0 : i32
    %c0_i32_0 = arith.constant 0 : i32
    return %arg0, %c0_i32 : i32, i32
  }
  func.func @transform_1(%arg0: i32) -> (i32, i32) {
    %c0_i32 = arith.constant 0 : i32
    %c0_i32_0 = arith.constant 0 : i32
    %c0_i32_1 = arith.constant 0 : i32
    return %c0_i32, %c0_i32_0 : i32, i32
  }
  func.func @transform_2(%arg0: i32) -> (i32, i32) {
    %c0_i32 = arith.constant 0 : i32
    %c0_i32_0 = arith.constant 0 : i32
    %c0_i32_1 = arith.constant 0 : i32
    return %c0_i32, %c0_i32_0 : i32, i32
  }
  func.func @transform_3(%arg0: i32) -> (i32, i32) {
    %c0_i32 = arith.constant 0 : i32
    %c0_i32_0 = arith.constant 0 : i32
    %c0_i32_1 = arith.constant 0 : i32
    return %c0_i32, %c0_i32_0 : i32, i32
  }
  func.func @transform_4(%arg0: i32) -> (i32, i32) {
    %c0_i32 = arith.constant 0 : i32
    %c0_i32_0 = arith.constant 0 : i32
    %c0_i32_1 = arith.constant 0 : i32
    return %c0_i32, %c0_i32_0 : i32, i32
  }
  func.func @transform_5(%arg0: i32) -> (i32, i32) {
    %c0_i32 = arith.constant 0 : i32
    %c0_i32_0 = arith.constant 0 : i32
    %c0_i32_1 = arith.constant 0 : i32
    return %c0_i32, %c0_i32_0 : i32, i32
  }
  func.func @transform_6(%arg0: i32) -> (i32, i32) {
    %c0_i32 = arith.constant 0 : i32
    %c0_i32_0 = arith.constant 0 : i32
    %c0_i32_1 = arith.constant 0 : i32
    return %c0_i32, %c0_i32_0 : i32, i32
  }
  func.func @transform_7(%arg0: i32) -> (i32, i32) {
    %c0_i32 = arith.constant 0 : i32
    %c0_i32_0 = arith.constant 0 : i32
    return %arg0, %c0_i32 : i32, i32
  }
}

</mosaic_0001>

<bundles_post_ra>
// kernel: _lambda_.1
= control target key start
LH: loop header
LB: loop body
LE: loop exit
PB: predicated region body
PF: predicated region fallthrough
CT: control target
= control target key end

     0   :  { %s2237_s24 = smov 0   ;;  %s2239_s25 = smov 0   ;;  %s2711_s0 = inlined_call_operand.vmem [shape: f32[24,784], index: 0, kind: input, shape index: {}]   ;;  %s2712_s1 = inlined_call_operand.vmem [shape: bf16[784,256], index: 1, kind: input, shape index: {}]   ;;  %s2713_s2 = inlined_call_operand.vmem [shape: f32[1,256], index: 2, kind: input, shape index: {}]   ;;  %s2714_s3 = inlined_call_operand.vmem [shape: bf16[256,128], index: 3, kind: input, shape index: {}]   ;;  %s2715_s4 = inlined_call_operand.vmem [shape: f32[1,128], index: 4, kind: input, shape index: {}]   ;;  %s2716_s5 = inlined_call_operand.vmem [shape: bf16[128,128], index: 5, kind: input, shape index: {}]   ;;  %s2717_s6 = inlined_call_operand.vmem [shape: f32[1,128], index: 6, kind: input, shape index: {}]   ;;  %s2718_s7 = inlined_call_operand.vmem [shape: f32[24,128], index: 7, kind: output, shape index: {}]  }
   0x1   :  { %s2241_s26 = smov 0  }
   0x2 LB: > { %s2250_s27 = sadd.s32 4294967295, %s2160_s26   ;;  %s2252_s28 = sadd.s32 1, %s2160_s26   ;;  %s2160_s26 = sphi %s2241_s26, %s2722_s26   ;;  %s2156_s25 = sphi %s2239_s25, %s2721_s25   ;;  %s2152_s24 = sphi %s2237_s24, %s2720_s24  }
   0x3   : > { %s173_s29 = ssub.s32 %s2160_s26, %s2252_s28  ;;  %s176_s30 = sadd.s32 1, %s2156_s25 }
   0x4   : > { %p174_p0 = scmp.eq.s32.totalorder %s173_s29, 0  ;;  %p186_p1 = scmp.ne.s32.totalorder %s2156_s25, %s2152_s24 }
   0x5   : > { %p187_p2 = scmp.eq.s32.totalorder %s2250_s27, 1  ;;  %p1627_p3 = scmp.ge.s32.totalorder %s2160_s26, 1 }
   0x6   : > { %s2260_s8 = scalar_select %p174_p0, %s2156_s25, %s176_s30  }
   0x7   : > { %p2262_p4 = por %p187_p2, %p186_p1  ;;  %p249_p5 = scmp.lt.s32.totalorder %s2160_s26, 3 }
   0x9   : > { %p250_p6 = pnand %p1627_p3, %p249_p5 }
   0xa   : > { %v1935_v0 = vld [vmem:[%s2712_s1 + $0x104] ss:$8 sps:$4 sm:$0xff] (!%p250_p6)   ;;  %v1937_v1 = vld [vmem:[%s2712_s1 + $0x100] ss:$8 sps:$4 sm:$0xff] (!%p250_p6)   ;;  %v1938_v2 = vld [vmem:[%s2712_s1 + $0x114] ss:$8 sps:$4 sm:$0xff] (!%p250_p6)  }
   0xb   : > { %253 = sbr.rel (%p250_p6) target bundleno = 862 (0x35e), region = 48  ;;  %977 = vmatprep.subr.bf16.mxu0 (!%p250_p6), %v1935_v0  ;;  %v1940_v3 = vld [vmem:[%s2712_s1 + $0x110] ss:$8 sps:$4 sm:$0xff] (!%p250_p6)   ;;  %s2279_s18 = sshll.u32 (!%p250_p6), %s2250_s27, 1  ;;  %v1941_v4 = vld [vmem:[%s2712_s1 + $0x124] ss:$8 sps:$4 sm:$0xff] (!%p250_p6)  }
   0xc   : > { %978 = vmatpush1.bf16.msra.mxu0 (!%p250_p6), %v1937_v1  ;;  %p292_p7 = scmp.lt.s32.totalorder (!%p250_p6), %s2279_s18, 2  ;;  %v1943_v5 = vld [vmem:[%s2712_s1 + $0x120] ss:$8 sps:$4 sm:$0xff] (!%p250_p6)   ;;  %v1944_v6 = vld [vmem:[%s2712_s1 + $0x134] ss:$8 sps:$4 sm:$0xff] (!%p250_p6)   ;;  %vm930_vm0 = vcmask (!%p250_p6), 130048  }
   0xd   : > { %979 = vmatprep.subr.bf16.mxu0 (!%p250_p6), %v1938_v2  ;;  %v1946_v7 = vld [vmem:[%s2712_s1 + $0x130] ss:$8 sps:$4 sm:$0xff] (!%p250_p6)   ;;  %v1947_v8 = vld [vmem:[%s2712_s1 + $0x144] ss:$8 sps:$4 sm:$0xff] (!%p250_p6)   ;;  %v1949_v9 = vld [vmem:[%s2712_s1 + $0x140] ss:$8 sps:$4 sm:$0xff] (!%p250_p6)  }
   0xe   : > { %v1950_v10 = vld [vmem:[%s2712_s1 + $0x154] ss:$8 sps:$4 sm:$0xff] (!%p250_p6)   ;;  %v1952_v11 = vld [vmem:[%s2712_s1 + $0x150] ss:$8 sps:$4 sm:$0xff] (!%p250_p6)   ;;  %v1953_v12 = vld [vmem:[%s2712_s1 + $0x164] ss:$8 sps:$4 sm:$0xff] (!%p250_p6)  }
   0xf   : > { %v1955_v16 = vld [vmem:[%s2712_s1 + $0x160] ss:$8 sps:$4 sm:$0xff] (!%p250_p6)   ;;  %v1956_v17 = vld [vmem:[%s2712_s1 + $0x174] ss:$8 sps:$4 sm:$0xff] (!%p250_p6)   ;;  %v1989_v18 = vld [vmem:[%s2712_s1 + $0x4] ss:$8 sps:$4 sm:$0xff] (!%p250_p6)  }
  0x10   : > { %980 = vmatpush1.bf16.msra.mxu0 (!%p250_p6), %v1940_v3  ;;  %v1958_v19 = vld [vmem:[%s2712_s1 + $0x170] ss:$8 sps:$4 sm:$0xff] (!%p250_p6)   ;;  %v1959_v20 = vld [vmem:[%s2712_s1 + $0x184] ss:$8 sps:$4 sm:$0xff] (!%p250_p6)   ;;  %v1994_v21 = vld [vmem:[%s2712_s1] ss:$8 sps:$4 sm:$0xff] (!%p250_p6)   ;;  %934 = vmatprep.subr.bf16.mxu1 (!%p250_p6), %v1989_v18 }
  0x11   : > { %981 = vmatprep.subr.bf16.mxu0 (!%p250_p6), %v1941_v4  ;;  %v1995_v22 = vld [vmem:[%s2712_s1 + $0x14] ss:$8 sps:$4 sm:$0xff] (!%p250_p6)   ;;  %935 = vmatpush1.bf16.msra.mxu1 (!%p250_p6), %v1994_v21  ;;  %v1961_v23 = vld [vmem:[%s2712_s1 + $0x180] ss:$8 sps:$4 sm:$0xff] (!%p250_p6)   ;;  %v2000_v24 = vld [vmem:[%s2712_s1 + $0x10] ss:$8 sps:$4 sm:$0xff] (!%p250_p6)  }
  0x12   : > { %s293_s29 = scalar_select %p292_p7, %s2279_s18, 2  ;;  %936 = vmatprep.subr.bf16.mxu1 %v1995_v22  ;;  %v2001_v25 = vld [vmem:[%s2712_s1 + $0x24] ss:$8 sps:$4 sm:$0xff]   ;;  %v1962_v26 = vld [vmem:[%s2712_s1 + $0x194] ss:$8 sps:$4 sm:$0xff]   ;;  %vm2196_vm1 = vmmov 0  }
  0x13   : > { %v2006_v27 = vld [vmem:[%s2712_s1 + $0x20] ss:$8 sps:$4 sm:$0xff]   ;;  %v2007_v28 = vld [vmem:[%s2712_s1 + $0x34] ss:$8 sps:$4 sm:$0xff]   ;;  %v1964_v29 = vld [vmem:[%s2712_s1 + $0x190] ss:$8 sps:$4 sm:$0xff]  }
  0x14   : > { %982 = vmatpush1.bf16.msra.mxu0 %v1943_v5  ;;  %s1843_s13 = smul.u32 56, %s293_s29  ;;  %v1965_v30 = vld [vmem:[%s2712_s1 + $0x1a4] ss:$8 sps:$4 sm:$0xff]   ;;  %v2012_v31 = vld [vmem:[%s2712_s1 + $0x30] ss:$8 sps:$4 sm:$0xff]   ;;  %s283_s20 = sand.u32 1, %s2152_s24  }
  0x15   : > { %983 = vmatprep.subr.bf16.mxu0 %v1944_v6  ;;  %937 = vmatpush1.bf16.msra.mxu1 %v2000_v24  ;;  %v2013_v32 = vld [vmem:[%s2712_s1 + $0x44] ss:$8 sps:$4 sm:$0xff]   ;;  %v1967_v33 = vld [vmem:[%s2712_s1 + $0x1a0] ss:$8 sps:$4 sm:$0xff]   ;;  %v1968_v34 = vld [vmem:[%s2712_s1 + $0x1b4] ss:$8 sps:$4 sm:$0xff]  }
  0x16   : > { %s2307_s21 = scalar_lea.vmem %s2711_s0, %s1843_s13  ;;  %938 = vmatprep.subr.bf16.mxu1 %v2001_v25  ;;  %v2018_v35 = vld [vmem:[%s2712_s1 + $0x40] ss:$8 sps:$4 sm:$0xff]   ;;  %v2019_v36 = vld [vmem:[%s2712_s1 + $0x54] ss:$8 sps:$4 sm:$0xff]   ;;  %v1970_v37 = vld [vmem:[%s2712_s1 + $0x1b0] ss:$8 sps:$4 sm:$0xff]  }
  0x17   : > { %v312_v13 = vld [vmem:[%s2307_s21 + $0x18] sm:$0xff]  ;;  %v319_v14 = vld [vmem:[%s2307_s21 + $0x50] sm:$0xff]  ;;  %v1971_v38 = vld [vmem:[%s2712_s1 + $0x1c4] ss:$8 sps:$4 sm:$0xff]   ;;  %s1628_s22 = sshll.u32 %s283_s20, 4  ;;  %s1413_s24 = ssub.s32 (%p2262_p4), 3, %s2279_s18 }
  0x18   : > { %984 = vmatpush1.bf16.msra.mxu0 %v1946_v7  ;;  %v326_v15 = vpack.c.bf16 %v319_v14, %v312_v13  ;;  %v2024_v39 = vld [vmem:[%s2712_s1 + $0x50] ss:$8 sps:$4 sm:$0xff]   ;;  %v2025_v40 = vld [vmem:[%s2712_s1 + $0x64] ss:$8 sps:$4 sm:$0xff]   ;;  %v1973_v41 = vld [vmem:[%s2712_s1 + $0x1c0] ss:$8 sps:$4 sm:$0xff]  }
  0x19   : > { %985 = vmatprep.subr.bf16.mxu0 %v1947_v8  ;;  %939 = vmatpush1.bf16.msra.mxu1 %v2006_v27  ;;  %v1974_v42 = vld [vmem:[%s2712_s1 + $0x1d4] ss:$8 sps:$4 sm:$0xff]   ;;  %v2030_v43 = vld [vmem:[%s2712_s1 + $0x60] ss:$8 sps:$4 sm:$0xff]   ;;  %v1976_v45 = vld [vmem:[%s2712_s1 + $0x1d0] ss:$8 sps:$4 sm:$0xff]  }
  0x1a   : > { %1009 = vmatprep.mubr.bf16.mxu0 %v326_v15  ;;  %940 = vmatprep.subr.bf16.mxu1 %v2007_v28  ;;  %v2031_v44 = vld [vmem:[%s2712_s1 + $0x74] ss:$8 sps:$4 sm:$0xff]   ;;  %v1977_v46 = vld [vmem:[%s2712_s1 + $0x1e4] ss:$8 sps:$4 sm:$0xff]   ;;  %v2036_v47 = vld [vmem:[%s2712_s1 + $0x70] ss:$8 sps:$4 sm:$0xff]  }
  0x1b   : > { %v2037_v48 = vld [vmem:[%s2712_s1 + $0x84] ss:$8 sps:$4 sm:$0xff]   ;;  %v1979_v49 = vld [vmem:[%s2712_s1 + $0x1e0] ss:$8 sps:$4 sm:$0xff]   ;;  %v1980_v50 = vld [vmem:[%s2712_s1 + $0x1f4] ss:$8 sps:$4 sm:$0xff]  }
  0x1c   : > { %986 = vmatpush1.bf16.msra.mxu0 %v1949_v9  ;;  %v2042_v51 = vld [vmem:[%s2712_s1 + $0x80] ss:$8 sps:$4 sm:$0xff]   ;;  %v2043_v52 = vld [vmem:[%s2712_s1 + $0x94] ss:$8 sps:$4 sm:$0xff]   ;;  %v1982_v53 = vld [vmem:[%s2712_s1 + $0x1f0] ss:$8 sps:$4 sm:$0xff]  }
  0x1d   : > { %987 = vmatprep.subr.bf16.mxu0 %v1950_v10  ;;  %941 = vmatpush1.bf16.msra.mxu1 %v2012_v31  ;;  %v311_v54 = vld [vmem:[%s2307_s21 + $0x10] sm:$0xff]  ;;  %v318_v55 = vld [vmem:[%s2307_s21 + $0x48] sm:$0xff]  ;;  %v321_v62 = vld [vmem:[%s2307_s21 + $0x60] sm:$0xff]  ;;  %s2666_s29 = scalar_lea.vmem [#allocation2], %s1628_s22   ;;  %p1414_p8 = scmp.lt.s32.totalorder (%p2262_p4), %s1413_s24, 2 }
  0x1e   : > { %942 = vmatprep.subr.bf16.mxu1 %v2013_v32  ;;  %v1985_v56 = vld [vmem:[%s2712_s1 + $0x204] ss:$8 sps:$4 sm:$0xff]   ;;  %v2048_v57 = vld [vmem:[%s2712_s1 + $0x90] ss:$8 sps:$4 sm:$0xff]   ;;  %v1983_v58 = vld [vmem:[%s2712_s1 + $0x200] ss:$8 sps:$4 sm:$0xff]   ;;  %v325_v59 = vpack.c.bf16 %v318_v55, %v311_v54 }
  0x1f   : > { %v2049_v60 = vld [vmem:[%s2712_s1 + $0xa4] ss:$8 sps:$4 sm:$0xff]   ;;  %v1988_v63 = vld [vmem:[%s2712_s1 + $0x214] ss:$8 sps:$4 sm:$0xff]   ;;  %v2054_v1 = vld [vmem:[%s2712_s1 + $0xa0] ss:$8 sps:$4 sm:$0xff]  }
  0x20   : > { %988 = vmatpush1.bf16.msra.mxu0 %v1952_v11  ;;  %v314_v61 = vld [vmem:[%s2307_s21 + $0x28] sm:$0xff]  ;;  %v2055_v2 = vld [vmem:[%s2712_s1 + $0xb4] ss:$8 sps:$4 sm:$0xff]   ;;  %v1986_v3 = vld [vmem:[%s2712_s1 + $0x210] ss:$8 sps:$4 sm:$0xff]  }
  0x21   : > { %989 = vmatprep.subr.bf16.mxu0 %v1953_v12  ;;  %943 = vmatpush1.bf16.msra.mxu1 %v2018_v35  ;;  %v328_v0 = vpack.c.bf16 %v321_v62, %v314_v61  ;;  %v1993_v4 = vld [vmem:[%s2712_s1 + $0x224] ss:$8 sps:$4 sm:$0xff]   ;;  %v2060_v7 = vld [vmem:[%s2712_s1 + $0xb0] ss:$8 sps:$4 sm:$0xff]   ;;  %v1991_v10 = vld [vmem:[%s2712_s1 + $0x220] ss:$8 sps:$4 sm:$0xff]  }
  0x22   : > { %944 = vmatprep.subr.bf16.mxu1 %v2019_v36  ;;  %v310_v5 = vld [vmem:[%s2307_s21 + $0x8] sm:$0xff]  ;;  %v317_v6 = vld [vmem:[%s2307_s21 + $0x40] sm:$0xff]  ;;  %v1999_v11 = vld [vmem:[%s2712_s1 + $0x234] ss:$8 sps:$4 sm:$0xff]   ;;  %v2194_v61 = vmov 0  }
  0x23   : > { %v324_v8 = vpack.c.bf16 %v317_v6, %v310_v5  ;;  %v2061_v9 = vld [vmem:[%s2712_s1 + $0xc4] ss:$8 sps:$4 sm:$0xff]   ;;  %v2066_v12 = vld [vmem:[%s2712_s1 + $0xc0] ss:$8 sps:$4 sm:$0xff]   ;;  %v2067_v13 = vld [vmem:[%s2712_s1 + $0xd4] ss:$8 sps:$4 sm:$0xff]  }
  0x24   : > { %990 = vmatpush1.bf16.msra.mxu0 %v1955_v16  ;;  %v1997_v14 = vld [vmem:[%s2712_s1 + $0x230] ss:$8 sps:$4 sm:$0xff]   ;;  %v2005_v15 = vld [vmem:[%s2712_s1 + $0x244] ss:$8 sps:$4 sm:$0xff]   ;;  %v2003_v16 = vld [vmem:[%s2712_s1 + $0x240] ss:$8 sps:$4 sm:$0xff]  }
  0x25   : > { %991 = vmatprep.subr.bf16.mxu0 %v1956_v17  ;;  %945 = vmatpush1.bf16.msra.mxu1 %v2024_v39  ;;  %v2072_v17 = vld [vmem:[%s2712_s1 + $0xd0] ss:$8 sps:$4 sm:$0xff]   ;;  %v2011_v18 = vld [vmem:[%s2712_s1 + $0x254] ss:$8 sps:$4 sm:$0xff]   ;;  %v309_v25 = vld [vmem:[%s2307_s21] sm:$0xff] }
  0x26   : > { %946 = vmatprep.subr.bf16.mxu1 %v2025_v40  ;;  %966 = vmatprep.mubr.bf16.mxu1 %v324_v8  ;;  %v2079_v21 = vld [vmem:[%s2712_s1 + $0xf4] ss:$8 sps:$4 sm:$0xff]   ;;  %v2009_v22 = vld [vmem:[%s2712_s1 + $0x250] ss:$8 sps:$4 sm:$0xff]   ;;  %v2082_v27 = vld [vmem:[%s2714_s3 + $0x40] sm:$0xff]   ;;  %v2195_v8 = vmov 0.0  }
  0x27   : > { %v2081_v24 = vld [vmem:[%s2712_s1 + $0xf0] ss:$8 sps:$4 sm:$0xff]   ;;  %v2015_v28 = vld [vmem:[%s2712_s1 + $0x260] ss:$8 sps:$4 sm:$0xff]   ;;  %v2071_v54 = vld [vmem:[%s2712_s1 + $0x2f4] ss:$8 sps:$4 sm:$0xff]  }
  0x28   : > { %992 = vmatpush1.bf16.msra.mxu0 %v1958_v19  ;;  %v2073_v19 = vld [vmem:[%s2712_s1 + $0xe4] ss:$8 sps:$4 sm:$0xff]   ;;  %v2086_v36 = vld [vmem:[%s2714_s3 + $0x50] sm:$0xff]   ;;  %v2088_v40 = vld [vmem:[%s2714_s3 + $0x58] sm:$0xff]  }
  0x29   : > { %993 = vmatprep.subr.bf16.mxu0 %v1959_v20  ;;  %947 = vmatpush1.bf16.msra.mxu1 %v2030_v43  ;;  %v2078_v20 = vld [vmem:[%s2712_s1 + $0xe0] ss:$8 sps:$4 sm:$0xff]   ;;  %v2087_v39 = vld [vmem:[%s2714_s3 + $0x10] sm:$0xff]   ;;  %v2089_v43 = vld [vmem:[%s2714_s3 + $0x18] sm:$0xff]  }
  0x2a   : > { %948 = vmatprep.subr.bf16.mxu1 %v2031_v44  ;;  %v2083_v31 = vld [vmem:[%s2714_s3] sm:$0xff]   ;;  %v2084_v32 = vld [vmem:[%s2714_s3 + $0x48] sm:$0xff]   ;;  %v2069_v55 = vld [vmem:[%s2712_s1 + $0x2f0] ss:$8 sps:$4 sm:$0xff]  }
  0x2b   : > { %v2085_v35 = vld [vmem:[%s2714_s3 + $0x8] sm:$0xff]   ;;  %v2090_v44 = vld [vmem:[%s2714_s3 + $0x60] sm:$0xff]   ;;  %v315_v62 = vld [vmem:[%s2307_s21 + $0x30] sm:$0xff] }
  0x2c   : > { %994 = vmatpush1.bf16.msra.mxu0 %v1961_v23  ;;  %v2017_v23 = vld [vmem:[%s2712_s1 + $0x264] ss:$8 sps:$4 sm:$0xff]   ;;  %v2095_v5 = vld [vmem:[%s2714_s3 + $0x30] sm:$0xff]   ;;  %v2096_v6 = vld [vmem:[%s2714_s3 + $0x78] sm:$0xff]  }
  0x2d   : > { %995 = vmatprep.subr.bf16.mxu0 %v1962_v26  ;;  %949 = vmatpush1.bf16.msra.mxu1 %v2036_v47  ;;  %v316_v26 = vld [vmem:[%s2307_s21 + $0x38] sm:$0xff] }
  0x2e   : > { %950 = vmatprep.subr.bf16.mxu1 %v2037_v48  ;;  %v2045_v47 = vld [vmem:[%s2712_s1 + $0x2b0] ss:$8 sps:$4 sm:$0xff]   ;;  %v2053_v48 = vld [vmem:[%s2712_s1 + $0x2c4] ss:$8 sps:$4 sm:$0xff]  }
  0x30   : > { %996 = vmatpush1.bf16.msra.mxu0 %v1964_v29  ;;  %v2023_v29 = vld [vmem:[%s2712_s1 + $0x274] ss:$8 sps:$4 sm:$0xff]  }
  0x31   : > { %997 = vmatprep.subr.bf16.mxu0 %v1965_v30  ;;  %951 = vmatpush1.bf16.msra.mxu1 %v2042_v51  ;;  %v323_v30 = vpack.c.bf16 %v316_v26, %v309_v25  ;;  %v2057_v51 = vld [vmem:[%s2712_s1 + $0x2d0] ss:$8 sps:$4 sm:$0xff]  }
  0x32   : > { %952 = vmatprep.subr.bf16.mxu1 %v2043_v52  ;;  %v2065_v52 = vld [vmem:[%s2712_s1 + $0x2e4] ss:$8 sps:$4 sm:$0xff]  }
  0x34   : > { %998 = vmatpush1.bf16.msra.mxu0 %v1967_v33  ;;  %v2021_v33 = vld [vmem:[%s2712_s1 + $0x270] ss:$8 sps:$4 sm:$0xff]  }
  0x35   : > { %999 = vmatprep.subr.bf16.mxu0 %v1968_v34  ;;  %953 = vmatpush1.bf16.msra.mxu1 %v2048_v57  ;;  %v2029_v34 = vld [vmem:[%s2712_s1 + $0x284] ss:$8 sps:$4 sm:$0xff]   ;;  %v320_v57 = vld [vmem:[%s2307_s21 + $0x58] sm:$0xff] }
  0x36   : > { %954 = vmatprep.subr.bf16.mxu1 %v2049_v60  ;;  %v2075_v60 = vld [vmem:[%s2712_s1 + $0x300] ss:$8 sps:$4 sm:$0xff]  }
  0x38   : > { %1000 = vmatpush1.bf16.msra.mxu0 %v1970_v37  ;;  %v2027_v37 = vld [vmem:[%s2712_s1 + $0x280] ss:$8 sps:$4 sm:$0xff]  }
  0x39   : > { %1001 = vmatprep.subr.bf16.mxu0 %v1971_v38  ;;  %955 = vmatpush1.bf16.msra.mxu1 %v2054_v1  ;;  %v2035_v38 = vld [vmem:[%s2712_s1 + $0x294] ss:$8 sps:$4 sm:$0xff]   ;;  %v2091_v1 = vld [vmem:[%s2714_s3 + $0x20] sm:$0xff]  }
  0x3a   : > { %956 = vmatprep.subr.bf16.mxu1 %v2055_v2  ;;  %v2092_v2 = vld [vmem:[%s2714_s3 + $0x68] sm:$0xff]  }
  0x3c   : > { %1002 = vmatpush1.bf16.msra.mxu0 %v1973_v41  ;;  %v2033_v41 = vld [vmem:[%s2712_s1 + $0x290] ss:$8 sps:$4 sm:$0xff]  }
  0x3d   : > { %1003 = vmatprep.subr.bf16.mxu0 %v1974_v42  ;;  %957 = vmatpush1.bf16.msra.mxu1 %v2060_v7  ;;  %v2041_v42 = vld [vmem:[%s2712_s1 + $0x2a4] ss:$8 sps:$4 sm:$0xff]   ;;  %v2097_v7 = vld [vmem:[%s2714_s3 + $0x38] sm:$0xff]  }
  0x3e   : > { %958 = vmatprep.subr.bf16.mxu1 %v2061_v9 }
  0x40   : > { %1004 = vmatpush1.bf16.msra.mxu0 %v1976_v45  ;;  %v2039_v45 = vld [vmem:[%s2712_s1 + $0x2a0] ss:$8 sps:$4 sm:$0xff]  }
  0x41   : > { %1005 = vmatprep.subr.bf16.mxu0 %v1977_v46  ;;  %959 = vmatpush1.bf16.msra.mxu1 %v2066_v12  ;;  %v2047_v46 = vld [vmem:[%s2712_s1 + $0x2b4] ss:$8 sps:$4 sm:$0xff]  }
  0x42   : > { %960 = vmatprep.subr.bf16.mxu1 %v2067_v13  ;;  %v430_v13 = vlaneseq }
  0x44   : > { %1006 = vmatpush1.bf16.msra.mxu0 %v1979_v49  ;;  %v2051_v49 = vld [vmem:[%s2712_s1 + $0x2c0] ss:$8 sps:$4 sm:$0xff]  }
  0x45   : > { %1007 = vmatprep.subr.bf16.mxu0 %v1980_v50  ;;  %961 = vmatpush1.bf16.msra.mxu1 %v2072_v17  ;;  %v2059_v50 = vld [vmem:[%s2712_s1 + $0x2d4] ss:$8 sps:$4 sm:$0xff]  }
  0x46   : > { %962 = vmatprep.subr.bf16.mxu1 %v2073_v19 }
  0x48   : > { %1008 = vmatpush1.bf16.msra.mxu0 %v1982_v53  ;;  %v2063_v53 = vld [vmem:[%s2712_s1 + $0x2e0] ss:$8 sps:$4 sm:$0xff]  }
  0x49   : > { %1020 = vmatprep.subr.bf16.mxu0 %v1985_v56  ;;  %963 = vmatpush1.bf16.msra.mxu1 %v2078_v20  ;;  %v313_v56 = vld [vmem:[%s2307_s21 + $0x20] sm:$0xff] }
  0x4a   : > { %964 = vmatprep.subr.bf16.mxu1 %v2079_v21 }
  0x4b   : > { %1010 = vmatmul.mubr.bf16.vlgmr.msra.gmra.mrb[0].mxu0 %v325_v59  ;;  %v327_v59 = vpack.c.bf16 %v320_v57, %v313_v56 }
  0x4c   : > { %1021 = vmatpush1.bf16.msra.mxu0 %v1983_v58  ;;  %1052 = vmatprep.mubr.bf16.mxu0 %v328_v0  ;;  %v2077_v58 = vld [vmem:[%s2712_s1 + $0x304] ss:$8 sps:$4 sm:$0xff]  }
  0x4d   : > { %1022 = vmatprep.subr.bf16.mxu0 %v1988_v63  ;;  %965 = vmatpush1.bf16.msra.mxu1 %v2081_v24  ;;  %v322_v63 = vld [vmem:[%s2307_s21 + $0x68] sm:$0xff]  ;;  %s1773_s21 = sshll.u32 (%p2262_p4), %s2250_s27, 4 }
  0x4e   : > { %1776 = vmatprep.subr.bf16.mxu1 %v2082_v27  ;;  %v329_v0 = vpack.c.bf16 %v322_v63, %v315_v62  ;;  %s2677_s11 = scalar_lea.vmem (%p2262_p4), %s2718_s7, %s1773_s21  }
  0x50   : > { %1023 = vmatpush1.bf16.msra.mxu0 %v1986_v3  ;;  %967 = vmatmul.mubr.bf16.vlgmr.msra.gmra.mrb[0].mxu1 %v323_v30  ;;  %v2093_v3 = vld [vmem:[%s2714_s3 + $0x28] sm:$0xff]  }
  0x51   : > { %1024 = vmatprep.subr.bf16.mxu0 %v1993_v4  ;;  %1777 = vmatpush3.bf16.msra.mxu1 %v2083_v31  ;;  %v2094_v4 = vld [vmem:[%s2714_s3 + $0x70] sm:$0xff]  }
  0x52   : > { %1778 = vmatprep.subr.bf16.mxu1 %v2084_v32 }
  0x54   : > { %1025 = vmatpush1.bf16.msra.mxu0 %v1991_v10 }
  0x55   : > { %1026 = vmatprep.subr.bf16.mxu0 %v1999_v11  ;;  %1779 = vmatpush3.bf16.msra.mxu1 %v2085_v35 }
  0x56   : > { %1780 = vmatprep.subr.bf16.mxu1 %v2086_v36 }
  0x58   : > { %1027 = vmatpush1.bf16.msra.mxu0 %v1997_v14  ;;  %v431_v14 = vshrl.u32 %v430_v13, 7 }
  0x59   : > { %1028 = vmatprep.subr.bf16.mxu0 %v2005_v15  ;;  %1781 = vmatpush3.bf16.msra.mxu1 %v2087_v39  ;;  %v2099_v39 = vld [vmem:[%s2716_s5 + $0x8] sm:$0xff]  }
  0x5a   : > { %1782 = vmatprep.subr.bf16.mxu1 %v2088_v40  ;;  %v432_v15 = vsub.s32 0, %v431_v14  ;;  %v436_v17 = vsub.s32 1, %v431_v14  ;;  %v2100_v40 = vld [vmem:[%s2716_s5 + $0x10] sm:$0xff]  }
  0x5c   : > { %1029 = vmatpush1.bf16.msra.mxu0 %v2003_v16  ;;  %v428_v16 = vld [vmem:[%s2713_s2] sm:$0x3] }
  0x5d   : > { %1030 = vmatprep.subr.bf16.mxu0 %v2011_v18  ;;  %1783 = vmatpush3.bf16.msra.mxu1 %v2089_v43  ;;  %v433_v18 = vrot.slane %v428_v16, %v432_v15  ;;  %v437_v19 = vrot.slane %v428_v16, %v436_v17  ;;  %v2103_v43 = vld [vmem:[%s2716_s5 + $0x28] sm:$0xff]  }
  0x5e   : > { %1784 = vmatprep.subr.bf16.mxu1 %v2090_v44  ;;  %v2104_v44 = vld [vmem:[%s2716_s5 + $0x30] sm:$0xff]  }
  0x60   : > { %1031 = vmatpush1.bf16.msra.mxu0 %v2009_v22 }
  0x61   : > { %1032 = vmatprep.subr.bf16.mxu0 %v2017_v23  ;;  %1785 = vmatpush3.bf16.msra.mxu1 %v2091_v1 }
  0x62   : > { %1786 = vmatprep.subr.bf16.mxu1 %v2092_v2 }
  0x64   : > { %1033 = vmatpush1.bf16.msra.mxu0 %v2015_v28 }
  0x65   : > { %1034 = vmatprep.subr.bf16.mxu0 %v2023_v29  ;;  %1787 = vmatpush3.bf16.msra.mxu1 %v2093_v3 }
  0x66   : > { %1788 = vmatprep.subr.bf16.mxu1 %v2094_v4 }
  0x68   : > { %1035 = vmatpush1.bf16.msra.mxu0 %v2021_v33 }
  0x69   : > { %1036 = vmatprep.subr.bf16.mxu0 %v2029_v34  ;;  %1789 = vmatpush3.bf16.msra.mxu1 %v2095_v5 }
  0x6a   : > { %1790 = vmatprep.subr.bf16.mxu1 %v2096_v6 }
  0x6c   : > { %1037 = vmatpush1.bf16.msra.mxu0 %v2027_v37 }
  0x6d   : > { %1038 = vmatprep.subr.bf16.mxu0 %v2035_v38  ;;  %1791 = vmatpush3.bf16.msra.mxu1 %v2097_v7  ;;  %v2098_v38 = vld [vmem:[%s2716_s5] sm:$0xff]  }
  0x6e   : > { %1807 = vmatprep.subr.bf16.mxu1 %v2195_v8 }
  0x70   : > { %1039 = vmatpush1.bf16.msra.mxu0 %v2033_v41  ;;  %v2101_v41 = vld [vmem:[%s2716_s5 + $0x18] sm:$0xff]  }
  0x71   : > { %1040 = vmatprep.subr.bf16.mxu0 %v2041_v42  ;;  %v2102_v42 = vld [vmem:[%s2716_s5 + $0x20] sm:$0xff]  }
  0x74   : > { %1041 = vmatpush1.bf16.msra.mxu0 %v2039_v45  ;;  %v2105_v45 = vld [vmem:[%s2716_s5 + $0x38] sm:$0xff]  }
  0x75   : > { %1042 = vmatprep.subr.bf16.mxu0 %v2047_v46 }
  0x78   : > { %1043 = vmatpush1.bf16.msra.mxu0 %v2045_v47  ;;  %v1730_v47 = vld [vmem:[%s2715_s4] ss:$0 sm:$0xff] }
  0x79   : > { %1044 = vmatprep.subr.bf16.mxu0 %v2053_v48 }
  0x7c   : > { %1045 = vmatpush1.bf16.msra.mxu0 %v2051_v49 }
  0x7d   : > { %1046 = vmatprep.subr.bf16.mxu0 %v2059_v50 }
  0x80   : > { %1047 = vmatpush1.bf16.msra.mxu0 %v2057_v51 }
  0x81   : > { %1048 = vmatprep.subr.bf16.mxu0 %v2065_v52 }
  0x84   : > { %1049 = vmatpush1.bf16.msra.mxu0 %v2063_v53 }
  0x85   : > { %1050 = vmatprep.subr.bf16.mxu0 %v2071_v54 }
  0x88   : > { %1051 = vmatpush1.bf16.msra.mxu0 %v2069_v55 }
  0x89   : > { %1063 = vmatprep.subr.bf16.mxu0 %v2077_v58  ;;  %v1747_v58 = vld [vmem:[%s2717_s6] ss:$0 sm:$0xff] }
  0x8b   : > { %1053 = vmatmul.mubr.bf16.vlgmr.msra.gmra.mrb[0].mxu0 %v327_v59 }
  0x8c   : > { %1064 = vmatpush1.bf16.msra.mxu0 %v2075_v60  ;;  %1095 = vmatprep.mubr.bf16.mxu0 %v2194_v61 }
  0x97   : > { %1729 = vmatmul.mubr.msk.bf16.vlgmr.msra.gmra.mrb[0].mxu0 %vm930_vm0, %v329_v0 }
 0x123   : > { %v968_v9 = vpop.f32.mrb[0].mxu1 }
 0x124   : > { %v970_v10 = vpop.f32.mrb[1].mxu1  ;;  %v969_v20 = vadd.f32 %v968_v9, %v433_v18 }
 0x125   : > { %v972_v11 = vpop.f32.mrb[2].mxu1  ;;  %v971_v21 = vadd.f32 %v970_v10, %v437_v19 }
 0x126   : > { %v974_v12 = vpop.f32.mrb[3].mxu1  ;;  %v973_v23 = vadd.f32 %v972_v11, %v433_v18 }
 0x127   : > { %v975_v26 = vadd.f32 %v974_v12, %v437_v19 }
 0x16a   : > { %v1097_v22 = vpop.f32.mrb[0].mxu0 }
 0x16b   : > { %v1828_v24 = vadd.f32 %v1097_v22, %v969_v20  ;;  %v1099_v25 = vpop.f32.mrb[1].mxu0 }
 0x16c   : > { %v1830_v27 = vadd.f32 %v1099_v25, %v971_v21  ;;  %v1101_v28 = vpop.f32.mrb[2].mxu0 }
 0x16d   : > { %v1832_v29 = vadd.f32 %v1101_v28, %v973_v23  ;;  %v1103_v30 = vpop.f32.mrb[3].mxu0  ;;  %v1106_v32 = vmax.f32 %v1828_v24, 0.0 }
 0x16e   : > { %v1834_v31 = vadd.f32 %v1103_v30, %v975_v26  ;;  %v1107_v34 = vmax.f32 %v1830_v27, 0.0 }
 0x16f   : > { %v1108_v33 = vmax.f32 %v1832_v29, 0.0 }
 0x170   : > { %v1109_v35 = vmax.f32 %v1834_v31, 0.0 }
 0x171   : > { %v1110_v36 = vpack.c.bf16 %v1108_v33, %v1106_v32 }
 0x172   : > { %v1111_v37 = vpack.c.bf16 %v1109_v35, %v1107_v34 }
 0x174   : > { %1279 = vmatprep.mubr.bf16.mxu1 %v1111_v37 }
 0x175   : > { %1280 = vmatmul.mubr.bf16.vlgmr.msra.gmra.mrb[4].mxu1 %v1110_v36 }
 0x176   : > { %1808 = vmatpush3.bf16.msra.mxu1 %v2098_v38  ;;  %1823 = vmatprep.mubr.msk.bf16.mxu1 %vm2196_vm1, %v2195_v8 }
 0x177   : > { %1809 = vmatprep.subr.bf16.mxu1 %v2195_v8 }
 0x17a   : > { %1810 = vmatpush3.bf16.msra.mxu1 %v2099_v39 }
 0x17b   : > { %1811 = vmatprep.subr.bf16.mxu1 %v2195_v8 }
 0x17e   : > { %1812 = vmatpush3.bf16.msra.mxu1 %v2100_v40 }
 0x17f   : > { %1813 = vmatprep.subr.bf16.mxu1 %v2195_v8 }
 0x182   : > { %1814 = vmatpush3.bf16.msra.mxu1 %v2101_v41 }
 0x183   : > { %1815 = vmatprep.subr.bf16.mxu1 %v2195_v8 }
 0x186   : > { %1816 = vmatpush3.bf16.msra.mxu1 %v2102_v42 }
 0x187   : > { %1817 = vmatprep.subr.bf16.mxu1 %v2195_v8 }
 0x18a   : > { %1818 = vmatpush3.bf16.msra.mxu1 %v2103_v43 }
 0x18b   : > { %1819 = vmatprep.subr.bf16.mxu1 %v2195_v8 }
 0x18e   : > { %1820 = vmatpush3.bf16.msra.mxu1 %v2104_v44 }
 0x18f   : > { %1821 = vmatprep.subr.bf16.mxu1 %v2195_v8 }
 0x192   : > { %1822 = vmatpush3.bf16.msra.mxu1 %v2105_v45 }
 0x248   : > { %v1792_v46 = vpop.f32.mrb[4].mxu1 }
 0x249   : > { %v1793_v48 = vpop.f32.mrb[5].mxu1 }
 0x24a   : > { %v1794_v49 = vadd.f32 %v1793_v48, %v1792_v46  ;;  %v1795_v50 = vpop.f32.mrb[6].mxu1 }
 0x24b   : > { %v1796_v51 = vpop.f32.mrb[7].mxu1 }
 0x24c   : > { %v1282_v52 = vadd.f32 %v1794_v49, %v1730_v47  ;;  %v1797_v53 = vadd.f32 %v1796_v51, %v1795_v50 }
 0x24e   : > { %v1285_v54 = vadd.f32 %v1797_v53, %v1730_v47  ;;  %v1288_v55 = vmax.f32 %v1282_v52, 0.0 }
 0x250   : > { %v1289_v56 = vmax.f32 %v1285_v54, 0.0 }
 0x252   : > { %v1290_v57 = vpack.c.bf16 %v1289_v56, %v1288_v55 }
 0x254   : > { %1824 = vmatmul.mubr.bf16.vlgmr.msra.gmra.mrb[8].mxu1 %v1290_v57 }
 0x326   : > { %1411 = sbr.rel (!%p2262_p4) target bundleno = 862 (0x35e), region = 52 }
 0x327   : > { %v1396_v59 = vpop.f32.mrb[8].mxu1 }
 0x328   : > { %v1397_v60 = vadd.f32 %v1747_v58, %v1396_v59  ;;  %v1825_v61 = vpop.f32.mrb[9].mxu1 }
 0x329   : > { %v1399_v62 = vpop.f32.mrb[10].mxu1 }
 0x32a   : > { %1403 = vst [vmem:[%s2666_s29] sm:$0xff] %v1397_v60  ;;  %v1400_v63 = vadd.f32 %v1747_v58, %v1399_v62  ;;  %v1826_v0 = vpop.f32.mrb[11].mxu1 }
 0x32c   : > { %1404 = vst [vmem:[%s2666_s29 + $0x8] sm:$0xff] %v1400_v63 }
 0x32d   : > { %s2724_s24 = smov (!%p1414_p8, %s1413_s24), 2 }
 0x32e   : > { %s1758_s12 = sshll.u32 %s2724_s24, 7 }
 0x32f   : > { %p1761_p9 = scmp.eq.s32.totalorder %s1758_s12, 0 }
 0x330   : > { %s2683_s13 = sshrl.u32 (!%p1761_p9), %s2724_s24, 1 }
 0x331   : > { %1422 = sbr.rel (%p1761_p9) target bundleno = 862 (0x35e), region = 56  ;;  %p1762_p10 = scmp.le.s32.totalorder (!%p1761_p9), %s2683_s13, 0 }
 0x338   : > { %1580 = sbr.rel (%p1762_p10) target bundleno = 841 (0x349), region = 132  ;;  %s2162_s27 = smov (!%p1762_p10), %s2677_s11  }
 0x339   : > { %s2166_s9 = smov (!%p1762_p10), %s2666_s29   ;;  %s2170_s18 = smov (!%p1762_p10), 0  }
 0x33a   : > { %s2174_s14 = smov (!%p1762_p10), 0  }
 0x33f LB: >> { %v1486_v1 = vld [vmem:[%s2168_s9] sm:$0xff]  ;;  %v1488_v2 = vld [vmem:[%s2168_s9 + $0x8] sm:$0xff]  ;;  %s1490_s15 = sadd.s32 1, %s2172_s18  ;;  %s1480_s14 = sadd.s32 1, %s2176_s14   ;;  %s2176_s14 = sphi %s2174_s14, %s1480_s14   ;;  %s2172_s18 = sphi %s2170_s18, %s2171_s18   ;;  %s2168_s9 = sphi %s2166_s9, %s1495_s9   ;;  %s2164_s27 = sphi %s2162_s27, %s1496_s27  }
 0x340   : >> { %1487 = vst [vmem:[%s2164_s27] sm:$0xff] %v1486_v1  ;;  %1489 = vst [vmem:[%s2164_s27 + $0x8] sm:$0xff] %v1488_v2  ;;  %p1491_p11 = scmp.ge.s32.totalorder %s1490_s15, %s2683_s13  ;;  %p1479_p12 = scmp.ge.s32.totalorder %s1480_s14, %s2683_s13 }
 0x342   : >> { %s2726_s15 = smov (%p1491_p11, %s1490_s15), 0  ;;  %1482 = sbr.rel (!%p1479_p12) target bundleno = 831 (0x33f), region = 138 }
 0x343   : >> { %s1763_s16 = sshll.u32 %s2726_s15, 4  ;;  %s2171_s18 = smov %s2726_s15  }
 0x344   : >> { %s1495_s9 = scalar_lea.vmem %s2666_s29, %s1763_s16 [#allocation2]   ;;  %s1496_s27 = scalar_lea.vmem %s2677_s11, %s1763_s16  }
 0x349 PF: > { %s2693_s17 = sand.u32 1, %s2724_s24   ;;  %s1774_s19 = sshll.u32 %s2683_s13, 4 }
 0x34a   : > { %s1501_s20 = scalar_lea.vmem %s2666_s29, %s1774_s19 [#allocation2]   ;;  %s1503_s22 = scalar_lea.vmem %s2677_s11, %s1774_s19  }
 0x34b   : > { %p1768_p13 = scmp.le.s32.totalorder %s2693_s17, 0 }
 0x34c   : > { %s2178_s23 = smov (!%p1768_p13), %s1503_s22   ;;  %s2182_s26 = smov (!%p1768_p13), %s1501_s20  }
 0x34d   : > { %1594 = sbr.rel (%p1768_p13) target bundleno = 862 (0x35e), region = 143  ;;  %s2186_s21 = smov (!%p1768_p13), 0  }
 0x34e   : > { %s2190_s30 = smov (!%p1768_p13), 0  }
 0x354 LB: >> { %v1513_v3 = vld [vmem:[%s2184_s26] sm:$0xff]  ;;  %s1515_s24 = sadd.s32 1, %s2188_s21  ;;  %s1507_s30 = sadd.s32 1, %s2192_s30   ;;  %s2192_s30 = sphi %s2190_s30, %s1507_s30   ;;  %s2188_s21 = sphi %s2186_s21, %s2187_s21   ;;  %s2184_s26 = sphi %s2182_s26, %s1520_s26   ;;  %s2180_s23 = sphi %s2178_s23, %s1521_s23  }
 0x355   : >> { %1514 = vst [vmem:[%s2180_s23] sm:$0xff] %v1513_v3  ;;  %p1516_p0 = scmp.ge.s32.totalorder %s1515_s24, %s2693_s17  ;;  %p1506_p1 = scmp.ge.s32.totalorder %s1507_s30, %s2693_s17 }
 0x357   : >> { %s2728_s24 = smov (%p1516_p0, %s1515_s24), 0  ;;  %1509 = sbr.rel (!%p1506_p1) target bundleno = 852 (0x354), region = 149 }
 0x358   : >> { %s1769_s29 = sshll.u32 %s2728_s24, 3  ;;  %s2187_s21 = smov %s2728_s24  }
 0x359   : >> { %s1520_s26 = scalar_lea.vmem %s1501_s20, %s1769_s29 [#allocation2]   ;;  %s1521_s23 = scalar_lea.vmem %s1503_s22, %s1769_s29  }
 0x35e PF: > { %p14_p2 = scmp.ge.s32.totalorder %s2252_s28, 4   ;;  %s2720_s24 = smov %s2156_s25 }
 0x35f   : > { %s2721_s25 = smov %s2260_s8  ;;  %s2722_s26 = smov %s2252_s28 }
 0x360   :  { %16 = sbr.rel (!%p14_p2) target bundleno = 2 (0x2), region = 160 }

</bundles_post_ra>
